<compile_context>
chip_gen: v5e
topology: v5e:2x2
jax: 0.10.0
libtpu: 0.0.40
codegen_flags: <defaults>
</compile_context>

<pallas_src>
import functools

import jax
import jax.numpy as jnp
from jax.experimental import pallas as pl
from jax.experimental.pallas import tpu as pltpu

_LANES = 128
_SUBLANES = 8


def _vdn_rowsum_kernel(x_ref, sel_ref, out_ref, *, precision):
    # x_ref  : (R, 128*A)  128 batch rows per block-row, agents contiguous
    # sel_ref: (128*A, 128) static 0/1 selection matrix
    # out_ref: (R, 128)    lane-dense per-batch-row sums
    out_ref[...] = jnp.dot(
        x_ref[...], sel_ref[...],
        preferred_element_type=jnp.float32,
        precision=precision,
    ).astype(out_ref.dtype)


def _rowsum_pallas(x2, rows, lane, n_agents, dtype, target_block_bytes):
    itemsize = jnp.dtype(dtype).itemsize
    # dtype-aware sublane alignment: 8 (f32), 16 (bf16), 32 (int8/fp8)
    align = max(_SUBLANES, 32 // itemsize)
    r_budget = max(align,
                   (target_block_bytes // (lane * itemsize)) // align * align)
    # Single full-extent block when it fits the budget (grid is a sequential
    # loop on v5e/v6e, so splitting small batches is pure overhead); otherwise
    # tile with aligned R and let Pallas mask the ragged last block.
    R = rows if rows <= r_budget else r_budget
    grid = (pl.cdiv(rows, R),)

    # Static 0/1 selection matrix: sel[j, k] = (j // A == k).
    j = jax.lax.broadcasted_iota(jnp.int32, (lane, _LANES), 0)
    k = jax.lax.broadcasted_iota(jnp.int32, (lane, _LANES), 1)
    sel = ((j // n_agents) == k).astype(dtype)

    cost = pl.CostEstimate(
        flops=2 * rows * lane * _LANES,
        transcendentals=0,
        bytes_accessed=(rows * lane * itemsize          # input read
                        + rows * _LANES * itemsize       # output write
                        + lane * _LANES * itemsize))     # selection matrix

    precision = (jax.lax.Precision.HIGHEST if dtype == jnp.float32
                 else jax.lax.Precision.DEFAULT)
    kern = functools.partial(_vdn_rowsum_kernel, precision=precision)

    return pl.pallas_call(
        kern,
        out_shape=jax.ShapeDtypeStruct((rows, _LANES), dtype),
        grid_spec=pltpu.PrefetchScalarGridSpec(
            num_scalar_prefetch=0,
            grid=grid,
            in_specs=[pl.BlockSpec((R, lane), lambda i: (i, 0)),
                      pl.BlockSpec((lane, _LANES), lambda i: (0, 0))],
            out_specs=pl.BlockSpec((R, _LANES), lambda i: (i, 0))),
        compiler_params=pltpu.CompilerParams(
            dimension_semantics=("parallel",)),
        cost_estimate=cost,
    )(x2, sel)


def vdn_mixer_forward(agent_qs, *, target_block_bytes=2 * 1024 * 1024):
    """q_tot = sum(agent_qs, axis=2, keepdims=True), agent_qs: (bs, T, A)."""
    assert agent_qs.ndim == 3, "expected agent_qs of shape (bs, T, n_agents)"
    if not jnp.issubdtype(agent_qs.dtype, jnp.floating):
        agent_qs = agent_qs.astype(jnp.float32)
    bs, T, A = agent_qs.shape
    dtype = agent_qs.dtype
    B = bs * T

    flat = agent_qs.reshape(B, A)                 # free row-major reshape
    B_main = (B // _LANES) * _LANES               # 128-aligned prefix
    parts = []

    if B_main > 0:
        x_main = flat if B_main == B else flat[:B_main]
        rows = B_main // _LANES
        lane = _LANES * A
        x2 = x_main.reshape(rows, lane)           # free row-major reshape
        out_main = _rowsum_pallas(x2, rows, lane, A, dtype, target_block_bytes)
        parts.append(out_main.reshape(B_main))

    if B_main < B:
        # Ragged tail (< 128 batch rows): tiny fused XLA reduction instead of
        # padding (and re-writing) the whole input in HBM.
        parts.append(jnp.sum(flat[B_main:], axis=-1).astype(dtype))

    q = parts[0] if len(parts) == 1 else jnp.concatenate(parts)
    return q.reshape(bs, T, 1)


def vdn_mixer_reference(agent_qs):
    return jnp.sum(agent_qs, axis=2, keepdims=True)


if __name__ == "__main__":
    key = jax.random.PRNGKey(0)
    k1, k2, k3 = jax.random.split(key, 3)

    fwd = jax.jit(vdn_mixer_forward)
    # Tiny-block variant to exercise the multi-step grid + ragged last block.
    fwd_tiny_blocks = jax.jit(functools.partial(vdn_mixer_forward,
                                                target_block_bytes=16 * 1024))

    cases = [
        (jax.random.normal(k1, (2, 128, 4), jnp.float32), fwd),        # 1 block
        (jax.random.normal(k2, (4, 600, 5), jnp.float32), fwd),        # block + tail
        (jax.random.normal(k3, (4, 1000, 4), jnp.float32), fwd_tiny_blocks),  # multi-block
    ]

    for qs, fn in cases:
        out = jax.block_until_ready(fn(qs))
        ref = vdn_mixer_reference(qs)
        assert out.shape == ref.shape, (out.shape, ref.shape)
        err = float(jnp.max(jnp.abs(out - ref)))
        assert jnp.allclose(out, ref, atol=1e-4, rtol=1e-4), f"max err {err}"

    print("KERNEL_OK")
</pallas_src>

<mosaic_0001>
module attributes {stable_mosaic.version = 11 : i64} {
  func.func @_vdn_rowsum_kernel(%arg0: i32, %arg1: memref<2x512xf32, #tpu.memory_space<vmem>>, %arg2: memref<512x128xf32, #tpu.memory_space<vmem>>, %arg3: memref<2x128xf32, #tpu.memory_space<vmem>>) attributes {dimension_semantics = [#tpu.dimension_semantics<parallel>], iteration_bounds = array<i64: 1>, scalar_prefetch = 0 : i64, scratch_operands = 0 : i64, tpu.core_type = #tpu.core_type<tc>, window_params = [{transform_indices = @transform_0, window_bounds = array<i64: 2, 512>}, {pipeline_mode = #tpu.pipeline_mode<synchronous>, transform_indices = @transform_1, window_bounds = array<i64: 512, 128>}, {transform_indices = @transform_2, window_bounds = array<i64: 2, 128>}]} {
    %c0 = arith.constant 0 : index
    %c0_0 = arith.constant 0 : index
    %0 = vector.load %arg1[%c0, %c0_0] : memref<2x512xf32, #tpu.memory_space<vmem>>, vector<2x512xf32>
    %c0_1 = arith.constant 0 : index
    %c0_2 = arith.constant 0 : index
    %1 = vector.load %arg2[%c0_1, %c0_2] : memref<512x128xf32, #tpu.memory_space<vmem>>, vector<512x128xf32>
    %cst = arith.constant dense<0.000000e+00> : vector<2x128xf32>
    %2 = tpu.matmul %0, %1, %cst {dimension_numbers = #tpu.dot_dimension_numbers<[1], [0], [0], [1], [0, 0, 1, 1], [], []>, precision = #tpu.contract_precision<fp32>} : vector<2x512xf32>, vector<512x128xf32>, vector<2x128xf32> -> vector<2x128xf32>
    %c0_3 = arith.constant 0 : index
    %c0_4 = arith.constant 0 : index
    %3 = vector.load %arg3[%c0_3, %c0_4] : memref<2x128xf32, #tpu.memory_space<vmem>>, vector<2x128xf32>
    tpu.vector_store %arg3[%c0_3, %c0_4], %2 {strides = array<i32>} : memref<2x128xf32, #tpu.memory_space<vmem>>, vector<2x128xf32>,
    return
  }
  func.func @transform_0(%arg0: i32) -> (i32, i32) {
    %c0_i32 = arith.constant 0 : i32
    %c0_i32_0 = arith.constant 0 : i32
    return %arg0, %c0_i32 : i32, i32
  }
  func.func @transform_1(%arg0: i32) -> (i32, i32) {
    %c0_i32 = arith.constant 0 : i32
    %c0_i32_0 = arith.constant 0 : i32
    %c0_i32_1 = arith.constant 0 : i32
    return %c0_i32, %c0_i32_0 : i32, i32
  }
  func.func @transform_2(%arg0: i32) -> (i32, i32) {
    %c0_i32 = arith.constant 0 : i32
    %c0_i32_0 = arith.constant 0 : i32
    return %arg0, %c0_i32 : i32, i32
  }
}

</mosaic_0001>

<bundles_post_ra>
// kernel: vdn_mixer_forward.1
= control target key start
LH: loop header
LB: loop body
LE: loop exit
PB: predicated region body
PF: predicated region fallthrough
CT: control target
= control target key end

     0   :  { %s2725_s0 = inlined_call_operand.vmem [shape: f32[2,512], index: 0, kind: input, shape index: {}]   ;;  %s2726_s1 = inlined_call_operand.vmem [shape: f32[512,128], index: 1, kind: input, shape index: {}]   ;;  %s2727_s2 = inlined_call_operand.hbm [shape: f32[2,128], index: 2, kind: output, shape index: {}]  }
   0x1   :  { %v28_v0 = vld [vmem:[%s2726_s1 + $0x78] sm:$0xff]  ;;  %v27_v1 = vld [vmem:[%s2726_s1 + $0x70] sm:$0xff]  ;;  %v26_v2 = vld [vmem:[%s2726_s1 + $0x68] sm:$0xff] }
   0x2   :  { %v1520_v3 = vand.u32 4294901760, %v28_v0  ;;  %v1522_v4 = vand.u32 4294901760, %v27_v1  ;;  %v1524_v5 = vand.u32 4294901760, %v26_v2  ;;  %v25_v6 = vld [vmem:[%s2726_s1 + $0x60] sm:$0xff]  ;;  %v24_v7 = vld [vmem:[%s2726_s1 + $0x58] sm:$0xff]  ;;  %v23_v8 = vld [vmem:[%s2726_s1 + $0x50] sm:$0xff] }
   0x3   :  { %v1535_v9 = vand.u32 4294901760, %v25_v6  ;;  %v1537_v10 = vand.u32 4294901760, %v24_v7  ;;  %v1539_v11 = vand.u32 4294901760, %v23_v8  ;;  %v22_v12 = vld [vmem:[%s2726_s1 + $0x48] sm:$0xff]  ;;  %v21_v13 = vld [vmem:[%s2726_s1 + $0x40] sm:$0xff]  ;;  %v20_v18 = vld [vmem:[%s2726_s1 + $0x38] sm:$0xff] }
   0x4   :  { %88 = vmatpush.msra.mxu0 %v1520_v3  ;;  %v1549_v14 = vsub.f32 %v28_v0, %v1520_v3  ;;  %v1552_v15 = vsub.f32 %v27_v1, %v1522_v4  ;;  %284 = vmatpush.msra.mxu3 %v1520_v3  ;;  %v1556_v16 = vsub.f32 %v26_v2, %v1524_v5  ;;  %v1558_v17 = vand.u32 4294901760, %v22_v12  ;;  %v19_v26 = vld [vmem:[%s2726_s1 + $0x30] sm:$0xff]  ;;  %v18_v34 = vld [vmem:[%s2726_s1 + $0x28] sm:$0xff] }
   0x5   :  { %v1564_v19 = vsub.f32 %v25_v6, %v1535_v9  ;;  %v1567_v20 = vsub.f32 %v24_v7, %v1537_v10  ;;  %v1570_v21 = vsub.f32 %v23_v8, %v1539_v11  ;;  %v1577_v25 = vand.u32 4294901760, %v21_v13 }
   0x6   :  { %90 = vmatpush.msra.mxu0 %v1522_v4  ;;  %231 = vmatpush.msra.mxu2 %v1549_v14  ;;  %v130_v22 = vand.u32 4294901760, %v1549_v14  ;;  %v2743_v23 = vand.u32 4294901760, %v1552_v15  ;;  %v2741_v24 = vand.u32 4294901760, %v1556_v16  ;;  %v1584_v28 = vand.u32 4294901760, %v20_v18 }
   0x7   :  { %286 = vmatpush.msra.mxu3 %v1522_v4  ;;  %v2739_v27 = vand.u32 4294901760, %v1564_v19  ;;  %v1587_v29 = vsub.f32 %v22_v12, %v1558_v17  ;;  %v2737_v33 = vand.u32 4294901760, %v1567_v20 }
   0x8   :  { %92 = vmatpush.msra.mxu0 %v1524_v5  ;;  %234 = vmatpush.msra.mxu2 %v1552_v15  ;;  %v131_v30 = vsub.f32 %v1549_v14, %v130_v22  ;;  %v137_v31 = vsub.f32 %v1552_v15, %v2743_v23  ;;  %v143_v32 = vsub.f32 %v1556_v16, %v2741_v24 }
   0x9   :  { %7 = vsyncpa [#allocation3], 0  ;;  %288 = vmatpush.msra.mxu3 %v1524_v5  ;;  %v1605_v35 = vand.u32 4294901760, %v19_v26  ;;  %v2736_v36 = vand.u32 4294901760, %v1570_v21  ;;  %v149_v39 = vsub.f32 %v1564_v19, %v2739_v27  ;;  %v1614_v40 = vsub.f32 %v21_v13, %v1577_v25  ;;  %v17_v42 = vld [vmem:[%s2726_s1 + $0x20] sm:$0xff]  ;;  %v16_v48 = vld [vmem:[%s2726_s1 + $0x18] sm:$0xff] }
   0xa   :  { %94 = vmatpush.msra.mxu0 %v1535_v9  ;;  %v132_v37 = vand.u32 4294901760, %v131_v30  ;;  %237 = vmatpush.msra.mxu2 %v1556_v16  ;;  %v138_v38 = vand.u32 4294901760, %v137_v31  ;;  %v1617_v41 = vand.u32 4294901760, %v18_v34  ;;  %v144_v43 = vand.u32 4294901760, %v143_v32  ;;  %v15_v54 = vld [vmem:[%s2726_s1 + $0x10] sm:$0xff]  ;;  %v12_v55 = vld [vmem:[%s2725_s0] sm:$0xff] }
   0xb   :  { %290 = vmatpush.msra.mxu3 %v1535_v9  ;;  %v155_v44 = vsub.f32 %v1567_v20, %v2737_v33  ;;  %v2734_v45 = vand.u32 4294901760, %v1587_v29  ;;  %v1628_v46 = vsub.f32 %v20_v18, %v1584_v28  ;;  %v161_v47 = vsub.f32 %v1570_v21, %v2736_v36  ;;  %v44_v60 = vld [vmem:[%s2726_s1 + $0xf8] sm:$0xff]  ;;  %78 = vst [vmem:[#allocation1] ss:$4 sm:$0xff] %v12_v55  ;;  %v14_v62 = vld [vmem:[%s2726_s1 + $0x8] sm:$0xff]  ;;  %v13_v6 = vld [vmem:[%s2726_s1] sm:$0xff] }
   0xc   :  { %96 = vmatpush.msra.mxu0 %v1537_v10  ;;  %133 = vmatpush.msra.mxu1 %v132_v37  ;;  %v150_v49 = vand.u32 4294901760, %v149_v39  ;;  %v1639_v50 = vand.u32 4294901760, %v17_v42  ;;  %v2733_v51 = vand.u32 4294901760, %v1614_v40  ;;  %v1643_v52 = vsub.f32 %v19_v26, %v1605_v35  ;;  %v43_v7 = vld [vmem:[%s2726_s1 + $0xf0] sm:$0xff]  ;;  %s1459_s26 = sshll.u32 %s2727_s2, 4  ;;  %s1460_s26 = int_to_ptr.hbm [resolvable:$true] %s1459_s26 }
   0xd   :  { %240 = vmatpush.msra.mxu2 %v1564_v19  ;;  %292 = vmatpush.msra.mxu3 %v1537_v10  ;;  %v1648_v53 = vsub.f32 %v18_v34, %v1617_v41  ;;  %v156_v56 = vand.u32 4294901760, %v155_v44  ;;  %v167_v57 = vsub.f32 %v1587_v29, %v2734_v45  ;;  %v1660_v58 = vand.u32 4294901760, %v16_v48  ;;  %v42_v34 = vld [vmem:[%s2726_s1 + $0xe8] sm:$0xff]  ;;  %v37_v45 = vld [vmem:[%s2726_s1 + $0xc0] sm:$0xff] }
   0xe   :  { %98 = vmatpush.msra.mxu0 %v1539_v11  ;;  %139 = vmatpush.msra.mxu1 %v138_v38  ;;  %v2732_v59 = vand.u32 4294901760, %v1628_v46  ;;  %v162_v61 = vand.u32 4294901760, %v161_v47  ;;  %v173_v63 = vsub.f32 %v1614_v40, %v2733_v51  ;;  %v1675_v0 = vand.u32 4294901760, %v15_v54  ;;  %v41_v47 = vld [vmem:[%s2726_s1 + $0xe0] sm:$0xff] }
   0xf   :  { %243 = vmatpush.msra.mxu2 %v1567_v20  ;;  %294 = vmatpush.msra.mxu3 %v1539_v11  ;;  %v2730_v1 = vand.u32 4294901760, %v1643_v52  ;;  %v1679_v2 = vsub.f32 %v17_v42, %v1639_v50  ;;  %v2729_v8 = vand.u32 4294901760, %v1648_v53  ;;  %v1690_v12 = vand.u32 4294901760, %v44_v60 }
  0x10   :  { %100 = vmatpush.msra.mxu0 %v1558_v17  ;;  %145 = vmatpush.msra.mxu1 %v144_v43  ;;  %v168_v13 = vand.u32 4294901760, %v167_v57  ;;  %v179_v18 = vsub.f32 %v1628_v46, %v2732_v59  ;;  %v1696_v26 = vand.u32 4294901760, %v14_v62  ;;  %v1699_v30 = vsub.f32 %v16_v48, %v1660_v58 }
  0x11   :  { %246 = vmatpush.msra.mxu2 %v1570_v21  ;;  %296 = vmatpush.msra.mxu3 %v1558_v17  ;;  %v1703_v31 = vand.u32 4294901760, %v13_v6  ;;  %v1705_v32 = vand.u32 4294901760, %v43_v7  ;;  %v174_v37 = vand.u32 4294901760, %v173_v63  ;;  %v185_v38 = vsub.f32 %v1643_v52, %v2730_v1 }
  0x12   :  { %102 = vmatpush.msra.mxu0 %v1577_v25  ;;  %151 = vmatpush.msra.mxu1 %v150_v49  ;;  %v2728_v39 = vand.u32 4294901760, %v1679_v2  ;;  %v1716_v42 = vsub.f32 %v15_v54, %v1675_v0  ;;  %v191_v43 = vsub.f32 %v1648_v53, %v2729_v8  ;;  %v1724_v44 = vsub.f32 %v44_v60, %v1690_v12  ;;  %v40_v60 = vld [vmem:[%s2726_s1 + $0xd8] sm:$0xff]  ;;  %v38_v8 = vld [vmem:[%s2726_s1 + $0xc8] sm:$0xff] }
  0x13   :  { %249 = vmatpush.msra.mxu2 %v1587_v29  ;;  %298 = vmatpush.msra.mxu3 %v1577_v25  ;;  %v180_v48 = vand.u32 4294901760, %v179_v18  ;;  %v2731_v49 = vand.u32 4294901760, %v1699_v30  ;;  %v1732_v54 = vsub.f32 %v14_v62, %v1696_v26  ;;  %v1734_v55 = vand.u32 4294901760, %v42_v34  ;;  %v39_v18 = vld [vmem:[%s2726_s1 + $0xd0] sm:$0xff] }
  0x14   :  { %104 = vmatpush.msra.mxu0 %v1584_v28  ;;  %157 = vmatpush.msra.mxu1 %v156_v56  ;;  %v1739_v56 = vsub.f32 %v13_v6, %v1703_v31  ;;  %v1742_v57 = vsub.f32 %v43_v7, %v1705_v32  ;;  %v197_v62 = vsub.f32 %v1679_v2, %v2728_v39  ;;  %v2735_v63 = vand.u32 4294901760, %v1716_v42 }
  0x15   :  { %252 = vmatpush.msra.mxu2 %v1614_v40  ;;  %300 = vmatpush.msra.mxu3 %v1584_v28  ;;  %2775 = vst [vmem:[#allocation5_spill] sm:$0xff] %v1734_v55  ;;  %v192_v6 = vand.u32 4294901760, %v191_v43  ;;  %v2738_v7 = vand.u32 4294901760, %v1724_v44  ;;  %v1766_v39 = vsub.f32 %v42_v34, %v1734_v55  ;;  %v1768_v43 = vand.u32 4294901760, %v40_v60 }
  0x16   :  { %106 = vmatpush.msra.mxu0 %v1605_v35  ;;  %163 = vmatpush.msra.mxu1 %v162_v61  ;;  %v186_v61 = vand.u32 4294901760, %v185_v38  ;;  %v2740_v38 = vand.u32 4294901760, %v1732_v54  ;;  %v2742_v1 = vand.u32 4294901760, %v1742_v57  ;;  %v209_v34 = vsub.f32 %v1716_v42, %v2735_v63 }
  0x17   :  { %255 = vmatpush.msra.mxu2 %v1628_v46  ;;  %302 = vmatpush.msra.mxu3 %v1605_v35  ;;  %v1784_v51 = vand.u32 4294901760, %v39_v18  ;;  %v2745_v36 = vand.u32 4294901760, %v1766_v39  ;;  %v1802_v33 = vsub.f32 %v40_v60, %v1768_v43  ;;  %v1809_v27 = vand.u32 4294901760, %v37_v45 }
  0x18   :  { %108 = vmatpush.msra.mxu0 %v1617_v41  ;;  %169 = vmatpush.msra.mxu1 %v168_v13  ;;  %v1752_v13 = vand.u32 4294901760, %v41_v47  ;;  %v215_v63 = vsub.f32 %v1732_v54, %v2740_v38 }
  0x19   :  { %258 = vmatpush.msra.mxu2 %v1643_v52  ;;  %304 = vmatpush.msra.mxu3 %v1617_v41  ;;  %v1820_v24 = vsub.f32 %v39_v18, %v1784_v51  ;;  %v484_v18 = vsub.f32 %v1766_v39, %v2745_v36  ;;  %v2747_v14 = vand.u32 4294901760, %v1802_v33 }
  0x1a   :  { %110 = vmatpush.msra.mxu0 %v1639_v50  ;;  %175 = vmatpush.msra.mxu1 %v174_v37  ;;  %v203_v37 = vsub.f32 %v1699_v30, %v2731_v49  ;;  %v198_v49 = vand.u32 4294901760, %v197_v62  ;;  %v1782_v59 = vsub.f32 %v41_v47, %v1752_v13  ;;  %v1794_v62 = vand.u32 4294901760, %v38_v8 }
  0x1b   :  { %261 = vmatpush.msra.mxu2 %v1648_v53  ;;  %306 = vmatpush.msra.mxu3 %v1639_v50 }
  0x1c   :  { %112 = vmatpush.msra.mxu0 %v1660_v58  ;;  %181 = vmatpush.msra.mxu1 %v180_v48  ;;  %v2744_v48 = vand.u32 4294901760, %v1739_v56  ;;  %v204_v47 = vand.u32 4294901760, %v203_v37  ;;  %v210_v37 = vand.u32 4294901760, %v209_v34  ;;  %v2746_v38 = vand.u32 4294901760, %v1782_v59 }
  0x1d   :  { %264 = vmatpush.msra.mxu2 %v1679_v2  ;;  %308 = vmatpush.msra.mxu3 %v1660_v58  ;;  %v1826_v23 = vsub.f32 %v38_v8, %v1794_v62  ;;  %v216_v34 = vand.u32 4294901760, %v215_v63  ;;  %v34_v63 = vld [vmem:[%s2726_s1 + $0xa8] sm:$0xff] }
  0x1e   :  { %114 = vmatpush.msra.mxu0 %v1675_v0  ;;  %187 = vmatpush.msra.mxu1 %v186_v61  ;;  %v472_v61 = vsub.f32 %v1724_v44, %v2738_v7  ;;  %v478_v7 = vsub.f32 %v1742_v57, %v2742_v1  ;;  %v221_v60 = vsub.f32 %v1739_v56, %v2744_v48 }
  0x1f   :  { %267 = vmatpush.msra.mxu2 %v1699_v30  ;;  %310 = vmatpush.msra.mxu3 %v1675_v0  ;;  %v1842_v48 = vsub.f32 %v37_v45, %v1809_v27  ;;  %v490_v36 = vsub.f32 %v1782_v59, %v2746_v38  ;;  %v496_v38 = vsub.f32 %v1802_v33, %v2747_v14  ;;  %v2779_v14 = vand.u32 4294901760, %v1820_v24 }
  0x20   :  { %116 = vmatpush.msra.mxu0 %v1696_v26  ;;  %193 = vmatpush.msra.mxu1 %v192_v6  ;;  %v36_v6 = vld [vmem:[%s2726_s1 + $0xb8] sm:$0xff]  ;;  %v473_v1 = vand.u32 4294901760, %v472_v61  ;;  %v2776_v61 = vand.u32 4294901760, %v1552_v15  ;;  %v479_v8 = vand.u32 4294901760, %v478_v7  ;;  %v2777_v7 = vand.u32 4294901760, %v1556_v16 }
  0x21   :  { %270 = vmatpush.msra.mxu2 %v1716_v42  ;;  %312 = vmatpush.msra.mxu3 %v1696_v26  ;;  %v1867_v16 = vand.u32 4294901760, %v34_v63 }
  0x22   :  { %118 = vmatpush.msra.mxu0 %v1703_v31  ;;  %199 = vmatpush.msra.mxu1 %v198_v49  ;;  %v35_v49 = vld [vmem:[%s2726_s1 + $0xb0] sm:$0xff] }
  0x23   :  { %273 = vmatpush.msra.mxu2 %v1732_v54  ;;  %314 = vmatpush.msra.mxu3 %v1703_v31 }
  0x24   :  { %325 = vmatpush.msrb.mxu0 %v130_v22  ;;  %205 = vmatpush.msra.mxu1 %v204_v47  ;;  %v1836_v22 = vand.u32 4294901760, %v36_v6  ;;  %v222_v47 = vand.u32 4294901760, %v221_v60  ;;  %v485_v60 = vand.u32 4294901760, %v484_v18  ;;  %v491_v18 = vand.u32 4294901760, %v490_v36 }
  0x25   :  { %276 = vmatpush.msra.mxu2 %v1739_v56  ;;  %474 = vmatpush.msrb.mxu3 %v473_v1  ;;  %v2778_v1 = vand.u32 4294901760, %v1564_v19  ;;  %v497_v36 = vand.u32 4294901760, %v496_v38  ;;  %v31_v38 = vld [vmem:[%s2726_s1 + $0x90] sm:$0xff] }
  0x26   :  { %329 = vmatpush.msrb.mxu0 %v2776_v61  ;;  %211 = vmatpush.msra.mxu1 %v210_v37  ;;  %v1852_v61 = vand.u32 4294901760, %v35_v49  ;;  %v33_v37 = vld [vmem:[%s2726_s1 + $0xa0] sm:$0xff]  ;;  %v1865_v15 = vsub.f32 %v36_v6, %v1836_v22  ;;  %v502_v6 = vsub.f32 %v1820_v24, %v2779_v14 }
  0x27   :  { %429 = vmatpush.msrb.mxu2 %v1690_v12  ;;  %480 = vmatpush.msrb.mxu3 %v479_v8  ;;  %v1882_v19 = vand.u32 4294901760, %v33_v37  ;;  %v2780_v8 = vand.u32 4294901760, %v1567_v20  ;;  %v2782_v20 = vand.u32 4294901760, %v1570_v21 }
  0x28   :  { %333 = vmatpush.msrb.mxu0 %v2777_v7  ;;  %217 = vmatpush.msra.mxu1 %v216_v34  ;;  %v32_v34 = vld [vmem:[%s2726_s1 + $0x98] sm:$0xff]  ;;  %v1880_v45 = vsub.f32 %v35_v49, %v1852_v61  ;;  %v79_v7 = vld.sshfl [vmem:[#allocation1] sm:$0xff pattern:$0x73625140]  ;;  %v2750_v14 = vand.u32 4294901760, %v1865_v15  ;;  %v1893_v49 = vsub.f32 %v34_v63, %v1867_v16  ;;  %v503_v63 = vand.u32 4294901760, %v502_v6 }
  0x29   :  { %431 = vmatpush.msrb.mxu2 %v1705_v32  ;;  %486 = vmatpush.msrb.mxu3 %v485_v60  ;;  %v1911_v21 = vand.u32 4294901760, %v79_v7  ;;  %v1924_v6 = vand.u32 4294901760, %v31_v38 }
  0x2a   :  { %337 = vmatpush.msrb.mxu0 %v2778_v1  ;;  %223 = vmatpush.msra.mxu1 %v222_v47  ;;  %v2781_v1 = vand.u32 4294901760, %v1826_v23  ;;  %v2751_v60 = vand.u32 4294901760, %v1880_v45 }
  0x2b   :  { %433 = vmatpush.msrb.mxu2 %v1734_v55  ;;  %v1895_v55 = vand.u32 4294901760, %v32_v34  ;;  %492 = vmatpush.msrb.mxu3 %v491_v18  ;;  %v531_v18 = vand.u32 4294901760, %v1893_v49 }
  0x2c   :  { %341 = vmatpush.msrb.mxu0 %v2780_v8  ;;  %392 = vmatpush.msrb.mxu1 %v1520_v3  ;;  %v508_v47 = vsub.f32 %v1826_v23, %v2781_v1  ;;  %v2783_v3 = vand.u32 4294901760, %v1842_v48  ;;  %v1909_v1 = vsub.f32 %v33_v37, %v1882_v19  ;;  %v520_v37 = vsub.f32 %v1865_v15, %v2750_v14 }
  0x2d   :  { %435 = vmatpush.msrb.mxu2 %v1752_v13  ;;  %498 = vmatpush.msrb.mxu3 %v497_v36  ;;  %v526_v36 = vsub.f32 %v1880_v45, %v2751_v60  ;;  %v1938_v14 = vsub.f32 %v79_v7, %v1911_v21  ;;  %v532_v7 = vsub.f32 %v1893_v49, %v531_v18  ;;  %v2787_v60 = vand.u32 4294901760, %v1643_v52 }
  0x2e   :  { %345 = vmatpush.msrb.mxu0 %v2782_v20  ;;  %394 = vmatpush.msrb.mxu1 %v1522_v4  ;;  %v514_v8 = vsub.f32 %v1842_v48, %v2783_v3  ;;  %v2784_v4 = vand.u32 4294901760, %v1587_v29  ;;  %v509_v20 = vand.u32 4294901760, %v508_v47  ;;  %v30_v3 = vld [vmem:[%s2726_s1 + $0x88] sm:$0xff]  ;;  %v1927_v29 = vsub.f32 %v32_v34, %v1895_v55 }
  0x2f   :  { %437 = vmatpush.msrb.mxu2 %v1768_v43  ;;  %504 = vmatpush.msrb.mxu3 %v503_v63  ;;  %v1940_v34 = vand.u32 4294901760, %v30_v3  ;;  %v2788_v52 = vand.u32 4294901760, %v1648_v53 }
  0x30   :  { %349 = vmatpush.msrb.mxu0 %v2784_v4  ;;  %396 = vmatpush.msrb.mxu1 %v1524_v5  ;;  %v2785_v5 = vand.u32 4294901760, %v1614_v40  ;;  %v515_v47 = vand.u32 4294901760, %v514_v8  ;;  %v537_v4 = vand.u32 4294901760, %v1909_v1  ;;  %v29_v40 = vld [vmem:[%s2726_s1 + $0x80] sm:$0xff]  ;;  %v521_v8 = vand.u32 4294901760, %v520_v37 }
  0x31   :  { %439 = vmatpush.msrb.mxu2 %v1784_v51  ;;  %510 = vmatpush.msrb.mxu3 %v509_v20  ;;  %v543_v63 = vand.u32 4294901760, %v1927_v29  ;;  %v121_v37 = vand.u32 4294901760, %v1938_v14 }
  0x32   :  { %353 = vmatpush.msrb.mxu0 %v2785_v5  ;;  %398 = vmatpush.msrb.mxu1 %v1535_v9  ;;  %v2786_v9 = vand.u32 4294901760, %v1628_v46  ;;  %v1954_v5 = vsub.f32 %v31_v38, %v1924_v6  ;;  %v1959_v46 = vand.u32 4294901760, %v29_v40  ;;  %v538_v20 = vsub.f32 %v1909_v1, %v537_v4 }
  0x33   :  { %441 = vmatpush.msrb.mxu2 %v1794_v62  ;;  %516 = vmatpush.msrb.mxu3 %v515_v47  ;;  %v1967_v38 = vsub.f32 %v30_v3, %v1940_v34  ;;  %v544_v47 = vsub.f32 %v1927_v29, %v543_v63  ;;  %v122_v3 = vsub.f32 %v1938_v14, %v121_v37 }
  0x34   :  { %357 = vmatpush.msrb.mxu0 %v2786_v9  ;;  %400 = vmatpush.msrb.mxu1 %v1537_v10  ;;  %v527_v10 = vand.u32 4294901760, %v526_v36  ;;  %v549_v36 = vand.u32 4294901760, %v1954_v5  ;;  %v2789_v9 = vand.u32 4294901760, %v1679_v2  ;;  %v1981_v53 = vsub.f32 %v29_v40, %v1959_v46 }
  0x35   :  { %443 = vmatpush.msrb.mxu2 %v1809_v27  ;;  %522 = vmatpush.msrb.mxu3 %v521_v8  ;;  %v555_v8 = vand.u32 4294901760, %v1967_v38  ;;  %v2791_v40 = vand.u32 4294901760, %v1716_v42  ;;  %v2793_v42 = vand.u32 4294901760, %v1739_v56 }
  0x36   :  { %361 = vmatpush.msrb.mxu0 %v2787_v60  ;;  %402 = vmatpush.msrb.mxu1 %v1539_v11  ;;  %v80_v11 = vld.sshfl [vmem:[#allocation1 + $0x8] sm:$0xff pattern:$0x73625140]  ;;  %v533_v60 = vand.u32 4294901760, %v532_v7  ;;  %v550_v2 = vsub.f32 %v1954_v5, %v549_v36 }
  0x37   :  { %445 = vmatpush.msrb.mxu2 %v1836_v22  ;;  %528 = vmatpush.msrb.mxu3 %v527_v10  ;;  %v1986_v7 = vand.u32 4294901760, %v80_v11  ;;  %v561_v10 = vand.u32 4294901760, %v1981_v53 }
  0x38   :  { %365 = vmatpush.msrb.mxu0 %v2788_v52  ;;  %404 = vmatpush.msrb.mxu1 %v1558_v17  ;;  %v539_v17 = vand.u32 4294901760, %v538_v20  ;;  %v2790_v52 = vand.u32 4294901760, %v1699_v30  ;;  %v123_v30 = vand.u32 4294901760, %v122_v3 }
  0x39   :  { %447 = vmatpush.msrb.mxu2 %v1852_v61  ;;  %534 = vmatpush.msrb.mxu3 %v533_v60  ;;  %v2004_v20 = vsub.f32 %v80_v11, %v1986_v7  ;;  %v2792_v60 = vand.u32 4294901760, %v1732_v54 }
  0x3a   :  { %369 = vmatpush.msrb.mxu0 %v2789_v9  ;;  %406 = vmatpush.msrb.mxu1 %v1577_v25  ;;  %v545_v25 = vand.u32 4294901760, %v544_v47  ;;  %v562_v47 = vsub.f32 %v1981_v53, %v561_v10 }
  0x3b   :  { %449 = vmatpush.msrb.mxu2 %v1867_v16  ;;  %540 = vmatpush.msrb.mxu3 %v539_v17  ;;  %v462_v11 = vand.u32 4294901760, %v2004_v20  ;;  %v51_v17 = vld [vmem:[%s2726_s1 + $0x130] sm:$0xff] }
  0x3c   :  { %373 = vmatpush.msrb.mxu0 %v2790_v52  ;;  %408 = vmatpush.msrb.mxu1 %v1584_v28  ;;  %v556_v28 = vsub.f32 %v1967_v38, %v555_v8 }
  0x3d   :  { %451 = vmatpush.msrb.mxu2 %v1882_v19  ;;  %546 = vmatpush.msrb.mxu3 %v545_v25 }
  0x3e   :  { %377 = vmatpush.msrb.mxu0 %v2791_v40  ;;  %410 = vmatpush.msrb.mxu1 %v1605_v35  ;;  %v551_v35 = vand.u32 4294901760, %v550_v2  ;;  %v557_v54 = vand.u32 4294901760, %v556_v28  ;;  %v49_v28 = vld [vmem:[%s2726_s1 + $0x120] sm:$0xff] }
  0x3f   :  { %453 = vmatpush.msrb.mxu2 %v1895_v55  ;;  %124 = vmatmul.f32.vlgmr.msra.gmra.mxu0 %v123_v30 }
  0x40   :  { %381 = vmatpush.msrb.mxu0 %v2792_v60  ;;  %412 = vmatpush.msrb.mxu1 %v1617_v41  ;;  %v563_v41 = vand.u32 4294901760, %v562_v47  ;;  %v81_v47 = vld.sshfl [vmem:[#allocation1 + $0x10] sm:$0xff pattern:$0x73625140] }
  0x41   :  { %455 = vmatpush.msrb.mxu2 %v1924_v6  ;;  %552 = vmatpush.msrb.mxu3 %v551_v35 }
  0x42   :  { %385 = vmatpush.msrb.mxu0 %v2793_v42  ;;  %414 = vmatpush.msrb.mxu1 %v1639_v50  ;;  %v463_v50 = vsub.f32 %v2004_v20, %v462_v11 }
  0x43   :  { %457 = vmatpush.msrb.mxu2 %v1940_v34  ;;  %558 = vmatpush.msrb.mxu3 %v557_v54 }
  0x44   :  { %572 = vmatpush.msra.mxu0 %v1724_v44  ;;  %416 = vmatpush.msrb.mxu1 %v1660_v58  ;;  %v2794_v58 = vand.u32 4294901760, %v1724_v44  ;;  %v464_v56 = vand.u32 4294901760, %v463_v50  ;;  %v2796_v44 = vand.u32 4294901760, %v1766_v39  ;;  %v2242_v50 = vand.u32 4294901760, %v49_v28 }
  0x45   :  { %279 = vmatmul.f32.vlgmr.msra.gmra.mxu2 %v1938_v14  ;;  %318 = vmatmul.f32.vlgmr.msra.gmra.mxu3 %v121_v37  ;;  %v52_v37 = vld [vmem:[%s2726_s1 + $0x138] sm:$0xff] }
  0x46   :  { %575 = vmatpush.msra.mxu0 %v1742_v57  ;;  %418 = vmatpush.msrb.mxu1 %v1675_v0  ;;  %v2795_v0 = vand.u32 4294901760, %v1742_v57  ;;  %v2798_v57 = vld [vmem:[#allocation5_spill] sm:$0xff]  ;;  %v2196_v52 = vand.u32 4294901760, %v52_v37 }
  0x47   :  { %459 = vmatpush.msrb.mxu2 %v1959_v46  ;;  %564 = vmatpush.msrb.mxu3 %v563_v41 }
  0x48   :  { %578 = vmatpush.msra.mxu0 %v1766_v39  ;;  %420 = vmatpush.msrb.mxu1 %v1696_v26  ;;  %v2797_v26 = vand.u32 4294901760, %v1782_v59 }
  0x49   :  { %666 = vmatpush.msra.mxu2 %v2794_v58  ;;  %225 = vmatmul.f32.vlgmr.msra.gmra.mxu1 %v1911_v21 }
  0x4a   :  { %581 = vmatpush.msra.mxu0 %v1782_v59  ;;  %733 = vmatpush.msra.mxu3 %v1690_v12  ;;  %v2800_v59 = vand.u32 4294901760, %v1820_v24 }
  0x4b   :  { %670 = vmatpush.msra.mxu2 %v2795_v0  ;;  %422 = vmatpush.msrb.mxu1 %v1703_v31  ;;  %v2802_v31 = vand.u32 4294901760, %v1842_v48 }
  0x4c   :  { %584 = vmatpush.msra.mxu0 %v1802_v33  ;;  %735 = vmatpush.msra.mxu3 %v1705_v32 }
  0x4d   :  { %625 = vmatpush.msra.mxu1 %v1690_v12  ;;  %674 = vmatpush.msra.mxu2 %v2796_v44  ;;  %v2799_v12 = vand.u32 4294901760, %v1802_v33  ;;  %v2801_v33 = vand.u32 4294901760, %v1826_v23  ;;  %v47_v44 = vld [vmem:[%s2726_s1 + $0x110] sm:$0xff] }
  0x4e   :  { %465 = vmatmul.f32.vlgmr.msrb.gmra.mxu2 %v464_v56  ;;  %587 = vmatpush.msra.mxu0 %v1820_v24  ;;  %v2803_v24 = vand.u32 4294901760, %v1865_v15 }
  0x4f   :  { %627 = vmatpush.msra.mxu1 %v1705_v32  ;;  %678 = vmatpush.msra.mxu2 %v2797_v26  ;;  %v2804_v32 = vand.u32 4294901760, %v1880_v45  ;;  %v2253_v26 = vand.u32 4294901760, %v81_v47 }
  0x50   :  { %737 = vmatpush.msra.mxu3 %v2798_v57  ;;  %387 = vmatmul.f32.vlgmr.msrb.gmra.mxu0 %v1911_v21 }
  0x51   :  { %566 = vmatmul.f32.vlgmr.msrb.gmra.mxu3 %v1986_v7  ;;  %590 = vmatpush.msra.mxu0 %v1826_v23  ;;  %v60_v23 = vld [vmem:[%s2726_s1 + $0x178] sm:$0xff] }
  0x52   :  { %629 = vmatpush.msra.mxu1 %v2798_v57  ;;  %682 = vmatpush.msra.mxu2 %v2799_v12  ;;  %v2086_v39 = vand.u32 4294901760, %v60_v23 }
  0x53   :  { %739 = vmatpush.msra.mxu3 %v1752_v13  ;;  %424 = vmatmul.f32.vlgmr.msrb.gmra.mxu1 %v1911_v21 }
  0x54   :  { %593 = vmatpush.msra.mxu0 %v1842_v48  ;;  %631 = vmatpush.msra.mxu1 %v1752_v13  ;;  %v58_v13 = vld [vmem:[%s2726_s1 + $0x168] sm:$0xff] }
  0x55   :  { %686 = vmatpush.msra.mxu2 %v2800_v59  ;;  %741 = vmatpush.msra.mxu3 %v1768_v43  ;;  %v2106_v48 = vand.u32 4294901760, %v58_v13 }
  0x56   :  { %596 = vmatpush.msra.mxu0 %v1865_v15  ;;  %633 = vmatpush.msra.mxu1 %v1768_v43  ;;  %v57_v43 = vld [vmem:[%s2726_s1 + $0x160] sm:$0xff] }
  0x57   :  { %690 = vmatpush.msra.mxu2 %v2801_v33  ;;  %743 = vmatpush.msra.mxu3 %v1784_v51  ;;  %v2119_v15 = vand.u32 4294901760, %v57_v43 }
  0x58   :  { %599 = vmatpush.msra.mxu0 %v1880_v45  ;;  %635 = vmatpush.msra.mxu1 %v1784_v51  ;;  %v59_v51 = vld [vmem:[%s2726_s1 + $0x170] sm:$0xff] }
  0x59   :  { %694 = vmatpush.msra.mxu2 %v2802_v31  ;;  %745 = vmatpush.msra.mxu3 %v1794_v62  ;;  %v55_v45 = vld [vmem:[%s2726_s1 + $0x150] sm:$0xff] }
  0x5a   :  { %602 = vmatpush.msra.mxu0 %v1893_v49  ;;  %637 = vmatpush.msra.mxu1 %v1794_v62  ;;  %v2109_v62 = vsub.f32 %v60_v23, %v2086_v39  ;;  %v2136_v49 = vsub.f32 %v58_v13, %v2106_v48  ;;  %v46_v13 = vld [vmem:[%s2726_s1 + $0x108] sm:$0xff] }
  0x5b   :  { %698 = vmatpush.msra.mxu2 %v2803_v24  ;;  %747 = vmatpush.msra.mxu3 %v1809_v27  ;;  %v2271_v24 = vand.u32 4294901760, %v47_v44 }
  0x5c   :  { %605 = vmatpush.msra.mxu0 %v1909_v1  ;;  %639 = vmatpush.msra.mxu1 %v1809_v27  ;;  %v2096_v27 = vand.u32 4294901760, %v59_v51  ;;  %v2140_v1 = vand.u32 4294901760, %v55_v45 }
  0x5d   :  { %702 = vmatpush.msra.mxu2 %v2804_v32  ;;  %749 = vmatpush.msra.mxu3 %v1836_v22  ;;  %v2275_v32 = vsub.f32 %v49_v28, %v2242_v50 }
  0x5e   :  { %608 = vmatpush.msra.mxu0 %v1927_v29  ;;  %641 = vmatpush.msra.mxu1 %v1836_v22  ;;  %v56_v22 = vld [vmem:[%s2726_s1 + $0x158] sm:$0xff]  ;;  %v53_v29 = vld [vmem:[%s2726_s1 + $0x140] sm:$0xff] }
  0x5f   :  { %706 = vmatpush.msra.mxu2 %v531_v18  ;;  %751 = vmatpush.msra.mxu3 %v1852_v61  ;;  %v2129_v14 = vand.u32 4294901760, %v56_v22  ;;  %v2150_v18 = vsub.f32 %v57_v43, %v2119_v15  ;;  %v2283_v43 = vsub.f32 %v81_v47, %v2253_v26 }
  0x60   :  { %611 = vmatpush.msra.mxu0 %v1954_v5  ;;  %643 = vmatpush.msra.mxu1 %v1852_v61  ;;  %v2122_v61 = vsub.f32 %v59_v51, %v2096_v27  ;;  %v2172_v5 = vsub.f32 %v55_v45, %v2140_v1 }
  0x61   :  { %710 = vmatpush.msra.mxu2 %v537_v4  ;;  %753 = vmatpush.msra.mxu3 %v1867_v16  ;;  %v2765_v9 = vand.u32 4294901760, %v2150_v18 }
  0x62   :  { %614 = vmatpush.msra.mxu0 %v1967_v38  ;;  %645 = vmatpush.msra.mxu1 %v1867_v16  ;;  %v812_v16 = vand.u32 4294901760, %v2109_v62  ;;  %v818_v21 = vand.u32 4294901760, %v2122_v61  ;;  %v2760_v25 = vand.u32 4294901760, %v2172_v5 }
  0x63   :  { %714 = vmatpush.msra.mxu2 %v543_v63  ;;  %755 = vmatpush.msra.mxu3 %v1882_v19  ;;  %v831_v40 = vsub.f32 %v2150_v18, %v2765_v9 }
  0x64   :  { %617 = vmatpush.msra.mxu0 %v1981_v53  ;;  %647 = vmatpush.msra.mxu1 %v1882_v19  ;;  %v54_v19 = vld [vmem:[%s2726_s1 + $0x148] sm:$0xff]  ;;  %v813_v4 = vsub.f32 %v2109_v62, %v812_v16  ;;  %v819_v38 = vsub.f32 %v2122_v61, %v818_v21  ;;  %v843_v54 = vsub.f32 %v2172_v5, %v2760_v25 }
  0x65   :  { %718 = vmatpush.msra.mxu2 %v549_v36  ;;  %757 = vmatpush.msra.mxu3 %v1895_v55  ;;  %v2166_v63 = vand.u32 4294901760, %v54_v19  ;;  %v2182_v36 = vand.u32 4294901760, %v53_v29  ;;  %v832_v41 = vand.u32 4294901760, %v831_v40 }
  0x66   :  { %620 = vmatmul.f32.vlgmr.msra.gmra.mxu0 %v2004_v20  ;;  %649 = vmatpush.msra.mxu1 %v1895_v55  ;;  %v2155_v55 = vsub.f32 %v56_v22, %v2129_v14  ;;  %v814_v3 = vand.u32 4294901760, %v813_v4  ;;  %v820_v2 = vand.u32 4294901760, %v819_v38  ;;  %v2231_v20 = vsub.f32 %v52_v37, %v2196_v52  ;;  %v76_v4 = vld [vmem:[%s2726_s1 + $0x1f8] sm:$0xff]  ;;  %v45_v38 = vld [vmem:[%s2726_s1 + $0x100] sm:$0xff] }
  0x67   :  { %770 = vmatpush.msrb.mxu0 %v2086_v39  ;;  %722 = vmatpush.msra.mxu2 %v555_v8  ;;  %v2215_v30 = vsub.f32 %v53_v29, %v2182_v36  ;;  %v844_v31 = vand.u32 4294901760, %v843_v54  ;;  %v2298_v37 = vand.u32 4294901760, %v46_v13  ;;  %v2314_v40 = vand.u32 4294901760, %v76_v4 }
  0x68   :  { %759 = vmatpush.msra.mxu3 %v1924_v6  ;;  %651 = vmatpush.msra.mxu1 %v1924_v6  ;;  %v824_v6 = vand.u32 4294901760, %v2136_v49  ;;  %v2762_v53 = vand.u32 4294901760, %v2155_v55  ;;  %v2756_v59 = vand.u32 4294901760, %v2231_v20  ;;  %v2323_v47 = vand.u32 4294901760, %v45_v38 }
  0x69   :  { %772 = vmatpush.msrb.mxu0 %v2096_v27  ;;  %726 = vmatpush.msra.mxu2 %v561_v10  ;;  %v2212_v10 = vand.u32 4294901760, %v51_v17  ;;  %v2757_v58 = vand.u32 4294901760, %v2215_v30 }
  0x6a   :  { %761 = vmatpush.msra.mxu3 %v1940_v34  ;;  %728 = vmatmul.f32.vlgmr.msra.gmra.mxu2 %v1986_v7  ;;  %v825_v8 = vsub.f32 %v2136_v49, %v824_v6  ;;  %v861_v45 = vsub.f32 %v2231_v20, %v2756_v59 }
  0x6b   :  { %774 = vmatpush.msrb.mxu0 %v2106_v48  ;;  %913 = vmatpush.msrb.mxu2 %v2109_v62  ;;  %v2246_v0 = vsub.f32 %v51_v17, %v2212_v10  ;;  %v855_v23 = vsub.f32 %v2215_v30, %v2757_v58  ;;  %v68_v62 = vld [vmem:[%s2726_s1 + $0x1b8] sm:$0xff] }
  0x6c   :  { %653 = vmatpush.msra.mxu1 %v1940_v34  ;;  %763 = vmatpush.msra.mxu3 %v1959_v46  ;;  %v2199_v34 = vsub.f32 %v54_v19, %v2166_v63  ;;  %v826_v60 = vand.u32 4294901760, %v825_v8  ;;  %v2752_v8 = vand.u32 4294901760, %v2275_v32  ;;  %v862_v28 = vand.u32 4294901760, %v861_v45 }
  0x6d   :  { %765 = vmatmul.f32.vlgmr.msra.gmra.mxu3 %v1986_v7  ;;  %776 = vmatpush.msrb.mxu0 %v2119_v15  ;;  %v50_v7 = vld [vmem:[%s2726_s1 + $0x128] sm:$0xff]  ;;  %v2755_v51 = vand.u32 4294901760, %v2246_v0  ;;  %v856_v17 = vand.u32 4294901760, %v855_v23  ;;  %v73_v23 = vld [vmem:[%s2726_s1 + $0x1e0] sm:$0xff] }
  0x6e   :  { %916 = vmatpush.msrb.mxu2 %v2122_v61  ;;  %966 = vmatpush.msrb.mxu3 %v2086_v39  ;;  %v2227_v35 = vand.u32 4294901760, %v50_v7  ;;  %v2759_v42 = vand.u32 4294901760, %v2199_v34  ;;  %v67_v61 = vld [vmem:[%s2726_s1 + $0x1b0] sm:$0xff] }
  0x6f   :  { %655 = vmatpush.msra.mxu1 %v1959_v46  ;;  %778 = vmatpush.msrb.mxu0 %v2129_v14  ;;  %v837_v46 = vsub.f32 %v2155_v55, %v2762_v53 }
  0x70   :  { %659 = vmatmul.f32.vlgmr.msra.gmra.mxu1 %v462_v11  ;;  %919 = vmatpush.msrb.mxu2 %v2136_v49  ;;  %v48_v11 = vld [vmem:[%s2726_s1 + $0x118] sm:$0xff]  ;;  %v849_v57 = vsub.f32 %v2199_v34, %v2759_v42  ;;  %v2263_v33 = vsub.f32 %v50_v7, %v2227_v35  ;;  %v2309_v7 = vsub.f32 %v47_v44, %v2271_v24 }
  0x71   :  { %815 = vmatpush.msrb.mxu1 %v814_v3  ;;  %968 = vmatpush.msrb.mxu3 %v2096_v27  ;;  %v838_v56 = vand.u32 4294901760, %v837_v46  ;;  %v2259_v12 = vand.u32 4294901760, %v48_v11  ;;  %v867_v3 = vsub.f32 %v2246_v0, %v2755_v51  ;;  %v75_v46 = vld [vmem:[%s2726_s1 + $0x1f0] sm:$0xff]  ;;  %v879_v44 = vsub.f32 %v2275_v32, %v2752_v8 }
  0x72   :  { %780 = vmatpush.msrb.mxu0 %v2140_v1  ;;  %922 = vmatpush.msrb.mxu2 %v2150_v18  ;;  %v850_v22 = vand.u32 4294901760, %v849_v57  ;;  %v2753_v19 = vand.u32 4294901760, %v2263_v33  ;;  %v2758_v57 = vand.u32 4294901760, %v2309_v7 }
  0x73   :  { %821 = vmatpush.msrb.mxu1 %v820_v2  ;;  %970 = vmatpush.msrb.mxu3 %v2106_v48  ;;  %v2291_v29 = vsub.f32 %v48_v11, %v2259_v12  ;;  %v803_v2 = vand.u32 4294901760, %v2283_v43  ;;  %v2329_v11 = vsub.f32 %v46_v13, %v2298_v37 }
  0x74   :  { %782 = vmatpush.msrb.mxu0 %v2166_v63  ;;  %925 = vmatpush.msrb.mxu2 %v2155_v55 }
  0x75   :  { %827 = vmatpush.msrb.mxu1 %v826_v60  ;;  %972 = vmatpush.msrb.mxu3 %v2119_v15  ;;  %v873_v60 = vsub.f32 %v2263_v33, %v2753_v19  ;;  %v2754_v54 = vand.u32 4294901760, %v2291_v29  ;;  %v804_v13 = vsub.f32 %v2283_v43, %v803_v2  ;;  %v72_v19 = vld [vmem:[%s2726_s1 + $0x1d8] sm:$0xff] }
  0x76   :  { %784 = vmatpush.msrb.mxu0 %v2182_v36  ;;  %928 = vmatpush.msrb.mxu2 %v2172_v5  ;;  %v2379_v58 = vand.u32 4294901760, %v72_v19 }
  0x77   :  { %833 = vmatpush.msrb.mxu1 %v832_v41  ;;  %974 = vmatpush.msrb.mxu3 %v2129_v14  ;;  %v74_v41 = vld [vmem:[%s2726_s1 + $0x1e8] sm:$0xff]  ;;  %v874_v45 = vand.u32 4294901760, %v873_v60  ;;  %v880_v60 = vand.u32 4294901760, %v879_v44  ;;  %v805_v51 = vand.u32 4294901760, %v804_v13 }
  0x78   :  { %786 = vmatpush.msrb.mxu0 %v2196_v52  ;;  %931 = vmatpush.msrb.mxu2 %v2199_v34  ;;  %v2359_v8 = vand.u32 4294901760, %v74_v41 }
  0x79   :  { %839 = vmatpush.msrb.mxu1 %v838_v56  ;;  %976 = vmatpush.msrb.mxu3 %v2140_v1  ;;  %v868_v56 = vand.u32 4294901760, %v867_v3  ;;  %v2357_v3 = vsub.f32 %v45_v38, %v2323_v47  ;;  %v891_v38 = vsub.f32 %v2309_v7, %v2758_v57 }
  0x7a   :  { %788 = vmatpush.msrb.mxu0 %v2212_v10  ;;  %934 = vmatpush.msrb.mxu2 %v2215_v30  ;;  %v2387_v57 = vsub.f32 %v74_v41, %v2359_v8 }
  0x7b   :  { %845 = vmatpush.msrb.mxu1 %v844_v31  ;;  %978 = vmatpush.msrb.mxu3 %v2166_v63  ;;  %v2339_v31 = vand.u32 4294901760, %v75_v46  ;;  %v892_v41 = vand.u32 4294901760, %v891_v38 }
  0x7c   :  { %790 = vmatpush.msrb.mxu0 %v2227_v35  ;;  %937 = vmatpush.msrb.mxu2 %v2231_v20  ;;  %v2766_v38 = vand.u32 4294901760, %v2387_v57 }
  0x7d   :  { %851 = vmatpush.msrb.mxu1 %v850_v22  ;;  %980 = vmatpush.msrb.mxu3 %v2182_v36  ;;  %v2350_v22 = vsub.f32 %v76_v4, %v2314_v40  ;;  %v2761_v4 = vand.u32 4294901760, %v2329_v11 }
  0x7e   :  { %792 = vmatpush.msrb.mxu0 %v2242_v50  ;;  %940 = vmatpush.msrb.mxu2 %v2246_v0 }
  0x7f   :  { %857 = vmatpush.msrb.mxu1 %v856_v17  ;;  %982 = vmatpush.msrb.mxu3 %v2196_v52  ;;  %v885_v17 = vsub.f32 %v2291_v29, %v2754_v54  ;;  %v2374_v54 = vsub.f32 %v75_v46, %v2339_v31  ;;  %v2763_v59 = vand.u32 4294901760, %v2350_v22  ;;  %v2764_v46 = vand.u32 4294901760, %v2357_v3 }
  0x80   :  { %794 = vmatpush.msrb.mxu0 %v2259_v12  ;;  %943 = vmatpush.msrb.mxu2 %v2263_v33  ;;  %v897_v13 = vsub.f32 %v2329_v11, %v2761_v4  ;;  %v2409_v4 = vsub.f32 %v72_v19, %v2379_v58 }
  0x81   :  { %863 = vmatpush.msrb.mxu1 %v862_v28  ;;  %984 = vmatpush.msrb.mxu3 %v2212_v10  ;;  %v2367_v28 = vand.u32 4294901760, %v73_v23  ;;  %v886_v44 = vand.u32 4294901760, %v885_v17  ;;  %v2767_v17 = vand.u32 4294901760, %v2374_v54 }
  0x82   :  { %796 = vmatpush.msrb.mxu0 %v2271_v24  ;;  %946 = vmatpush.msrb.mxu2 %v2275_v32  ;;  %v898_v19 = vand.u32 4294901760, %v897_v13  ;;  %v2769_v9 = vand.u32 4294901760, %v2409_v4 }
  0x83   :  { %869 = vmatpush.msrb.mxu1 %v868_v56  ;;  %986 = vmatpush.msrb.mxu3 %v2227_v35  ;;  %v71_v56 = vld [vmem:[%s2726_s1 + $0x1d0] sm:$0xff]  ;;  %v2395_v42 = vsub.f32 %v73_v23, %v2367_v28  ;;  %v1154_v23 = vsub.f32 %v2350_v22, %v2763_v59 }
  0x84   :  { %798 = vmatpush.msrb.mxu0 %v2298_v37  ;;  %949 = vmatpush.msrb.mxu2 %v2291_v29  ;;  %v2402_v25 = vand.u32 4294901760, %v71_v56 }
  0x85   :  { %875 = vmatpush.msrb.mxu1 %v874_v45  ;;  %988 = vmatpush.msrb.mxu3 %v2242_v50  ;;  %v70_v45 = vld [vmem:[%s2726_s1 + $0x1c8] sm:$0xff]  ;;  %v2768_v59 = vand.u32 4294901760, %v2395_v42  ;;  %v1155_v13 = vand.u32 4294901760, %v1154_v23  ;;  %v2453_v23 = vand.u32 4294901760, %v68_v62 }
  0x86   :  { %800 = vmatpush.msrb.mxu0 %v2323_v47  ;;  %952 = vmatpush.msrb.mxu2 %v2309_v7  ;;  %v2420_v53 = vand.u32 4294901760, %v70_v45 }
  0x87   :  { %881 = vmatpush.msrb.mxu1 %v880_v60  ;;  %990 = vmatpush.msrb.mxu3 %v2259_v12  ;;  %v69_v60 = vld [vmem:[%s2726_s1 + $0x1c0] sm:$0xff]  ;;  %v1172_v49 = vsub.f32 %v2395_v42, %v2768_v59  ;;  %v1178_v59 = vsub.f32 %v2409_v4, %v2769_v9 }
  0x88   :  { %806 = vmatmul.f32.vlgmr.msrb.gmra.mxu0 %v805_v51  ;;  %955 = vmatpush.msrb.mxu2 %v2329_v11  ;;  %v903_v51 = vsub.f32 %v2357_v3, %v2764_v46  ;;  %v2436_v46 = vand.u32 4294901760, %v69_v60 }
  0x89   :  { %1007 = vmatpush.msra.mxu0 %v812_v16  ;;  %887 = vmatpush.msrb.mxu1 %v886_v44  ;;  %v1160_v16 = vsub.f32 %v2374_v54, %v2767_v17  ;;  %v2434_v44 = vsub.f32 %v71_v56, %v2402_v25  ;;  %v1166_v56 = vsub.f32 %v2387_v57, %v2766_v38  ;;  %v2470_v17 = vand.u32 4294901760, %v67_v61 }
  0x8a   :  { %992 = vmatpush.msrb.mxu3 %v2271_v24  ;;  %958 = vmatpush.msrb.mxu2 %v2357_v3  ;;  %v1179_v9 = vand.u32 4294901760, %v1178_v59  ;;  %v2808_v59 = vand.u32 4294901760, %v2199_v34  ;;  %v62_v34 = vld [vmem:[%s2726_s1 + $0x188] sm:$0xff] }
  0x8b   :  { %1011 = vmatpush.msra.mxu0 %v818_v21  ;;  %893 = vmatpush.msrb.mxu1 %v892_v41  ;;  %v904_v21 = vand.u32 4294901760, %v903_v51  ;;  %v2451_v41 = vsub.f32 %v70_v45, %v2420_v53  ;;  %v2805_v51 = vand.u32 4294901760, %v2150_v18  ;;  %v1161_v45 = vand.u32 4294901760, %v1160_v16  ;;  %v65_v18 = vld [vmem:[%s2726_s1 + $0x1a0] sm:$0xff] }
  0x8c   :  { %994 = vmatpush.msrb.mxu3 %v2298_v37  ;;  %961 = vmatmul.f32.vlgmr.msrb.gmra.mxu2 %v2283_v43  ;;  %v2770_v38 = vand.u32 4294901760, %v2434_v44  ;;  %v2806_v43 = vand.u32 4294901760, %v2155_v55  ;;  %v2483_v16 = vsub.f32 %v68_v62, %v2453_v23 }
  0x8d   :  { %1015 = vmatpush.msra.mxu0 %v824_v6  ;;  %1111 = vmatpush.msra.mxu2 %v2314_v40  ;;  %v66_v6 = vld [vmem:[%s2726_s1 + $0x1a8] sm:$0xff] }
  0x8e   :  { %899 = vmatpush.msrb.mxu1 %v898_v19  ;;  %996 = vmatpush.msrb.mxu3 %v2323_v47  ;;  %v2468_v19 = vsub.f32 %v69_v60, %v2436_v46  ;;  %v2771_v60 = vand.u32 4294901760, %v2451_v41  ;;  %v1184_v55 = vsub.f32 %v2434_v44, %v2770_v38 }
  0x8f   :  { %1000 = vmatmul.f32.vlgmr.msrb.gmra.mxu3 %v803_v2  ;;  %1019 = vmatpush.msra.mxu0 %v2805_v51  ;;  %v1167_v2 = vand.u32 4294901760, %v1166_v56  ;;  %v2485_v51 = vand.u32 4294901760, %v66_v6  ;;  %v2498_v56 = vsub.f32 %v67_v61, %v2470_v17 }
  0x90   :  { %1113 = vmatpush.msra.mxu2 %v2339_v31  ;;  %1156 = vmatpush.msra.mxu3 %v1155_v13  ;;  %v1173_v13 = vand.u32 4294901760, %v1172_v49  ;;  %v2772_v62 = vand.u32 4294901760, %v2468_v19  ;;  %v2807_v49 = vand.u32 4294901760, %v2172_v5  ;;  %v63_v5 = vld [vmem:[%s2726_s1 + $0x190] sm:$0xff] }
  0x91   :  { %905 = vmatpush.msrb.mxu1 %v904_v21  ;;  %1023 = vmatpush.msra.mxu0 %v2806_v43  ;;  %v64_v21 = vld [vmem:[%s2726_s1 + $0x198] sm:$0xff]  ;;  %v2500_v43 = vand.u32 4294901760, %v65_v18  ;;  %v2511_v61 = vsub.f32 %v66_v6, %v2485_v51 }
  0x92   :  { %907 = vmatmul.f32.vlgmr.msrb.gmra.mxu1 %v2253_v26  ;;  %1115 = vmatpush.msra.mxu2 %v2359_v8  ;;  %v2513_v38 = vand.u32 4294901760, %v64_v21  ;;  %v1196_v6 = vsub.f32 %v2468_v19, %v2772_v62 }
  0x93   :  { %1074 = vmatpush.msra.mxu1 %v2086_v39  ;;  %1162 = vmatpush.msra.mxu3 %v1161_v45  ;;  %v1190_v39 = vsub.f32 %v2451_v41, %v2771_v60  ;;  %v2773_v45 = vand.u32 4294901760, %v2483_v16  ;;  %v2809_v60 = vand.u32 4294901760, %v2215_v30  ;;  %v61_v30 = vld [vmem:[%s2726_s1 + $0x180] sm:$0xff]  ;;  %s1495_s1 = smov [#allocation2]  }
  0x94   :  { %1027 = vmatpush.msra.mxu0 %v2807_v49  ;;  %1117 = vmatpush.msra.mxu2 %v2367_v28  ;;  %v2527_v49 = vsub.f32 %v65_v18, %v2500_v43  ;;  %v2543_v62 = vsub.f32 %v64_v21, %v2513_v38  ;;  %s1457_s23 = sshll.u32 %s1495_s1, 4  ;;  %s1458_s23 = int_to_ptr.vmem [resolvable:$true] %s1457_s23 }
  0x95   :  { %1076 = vmatpush.msra.mxu1 %v2096_v27  ;;  %1168 = vmatpush.msra.mxu3 %v1167_v2  ;;  %v1185_v27 = vand.u32 4294901760, %v1184_v55  ;;  %v2774_v2 = vand.u32 4294901760, %v2498_v56  ;;  %v1202_v18 = vsub.f32 %v2483_v16, %v2773_v45  ;;  %v2811_v55 = vand.u32 4294901760, %v2246_v0 }
  0x96   :  { %1031 = vmatpush.msra.mxu0 %v2808_v59  ;;  %1119 = vmatpush.msra.mxu2 %v2379_v58  ;;  %v82_v59 = vld.sshfl [vmem:[#allocation1 + $0x18] sm:$0xff pattern:$0x73625140]  ;;  %v1219_v45 = vand.u32 4294901760, %v2527_v49  ;;  %v2813_v0 = vand.u32 4294901760, %v2263_v33 }
  0x97   :  { %1078 = vmatpush.msra.mxu1 %v2106_v48  ;;  %1174 = vmatpush.msra.mxu3 %v1173_v13  ;;  %v2535_v48 = vand.u32 4294901760, %v63_v5  ;;  %v1191_v13 = vand.u32 4294901760, %v1190_v39  ;;  %v1197_v39 = vand.u32 4294901760, %v1196_v6  ;;  %v1208_v21 = vsub.f32 %v2498_v56, %v2774_v2 }
  0x98   :  { %1035 = vmatpush.msra.mxu0 %v2809_v60  ;;  %1121 = vmatpush.msra.mxu2 %v2402_v25  ;;  %v2810_v60 = vand.u32 4294901760, %v2231_v20  ;;  %v1225_v2 = vand.u32 4294901760, %v2543_v62 }
  0x99   :  { %1080 = vmatpush.msra.mxu1 %v2119_v15  ;;  %1180 = vmatpush.msra.mxu3 %v1179_v9  ;;  %v2551_v15 = vand.u32 4294901760, %v62_v34  ;;  %v2553_v9 = vand.u32 4294901760, %v82_v59  ;;  %v2564_v20 = vsub.f32 %v63_v5, %v2535_v48 }
  0x9a   :  { %1039 = vmatpush.msra.mxu0 %v2810_v60  ;;  %1123 = vmatpush.msra.mxu2 %v2420_v53  ;;  %v2566_v60 = vand.u32 4294901760, %v61_v30 }
  0x9b   :  { %1082 = vmatpush.msra.mxu1 %v2129_v14  ;;  %1186 = vmatpush.msra.mxu3 %v1185_v27  ;;  %v1203_v14 = vand.u32 4294901760, %v1202_v18  ;;  %v2812_v27 = vand.u32 4294901760, %v2511_v61  ;;  %v2577_v5 = vsub.f32 %v62_v34, %v2551_v15  ;;  %v2814_v18 = vand.u32 4294901760, %v2275_v32 }
  0x9c   :  { %1043 = vmatpush.msra.mxu0 %v2811_v55  ;;  %1125 = vmatpush.msra.mxu2 %v2436_v46  ;;  %v2580_v55 = vsub.f32 %v82_v59, %v2553_v9  ;;  %v1231_v33 = vand.u32 4294901760, %v2564_v20  ;;  %v2591_v34 = vsub.f32 %v61_v30, %v2566_v60  ;;  %v1226_v59 = vsub.f32 %v2543_v62, %v1225_v2 }
  0x9d   :  { %1084 = vmatpush.msra.mxu1 %v2140_v1  ;;  %1192 = vmatpush.msra.mxu3 %v1191_v13  ;;  %v1214_v6 = vsub.f32 %v2511_v61, %v2812_v27  ;;  %v1209_v1 = vand.u32 4294901760, %v1208_v21  ;;  %v1220_v13 = vsub.f32 %v2527_v49, %v1219_v45  ;;  %v1237_v32 = vand.u32 4294901760, %v2577_v5 }
  0x9e   :  { %1047 = vmatpush.msra.mxu0 %v2813_v0  ;;  %1127 = vmatpush.msra.mxu2 %v2453_v23  ;;  %v1144_v21 = vand.u32 4294901760, %v2580_v55  ;;  %v1227_v27 = vand.u32 4294901760, %v1226_v59 }
  0x9f   :  { %1086 = vmatpush.msra.mxu1 %v2166_v63  ;;  %1198 = vmatpush.msra.mxu3 %v1197_v39  ;;  %v1215_v63 = vand.u32 4294901760, %v1214_v6  ;;  %v2815_v39 = vand.u32 4294901760, %v2291_v29  ;;  %v1221_v30 = vand.u32 4294901760, %v1220_v13  ;;  %v1232_v29 = vsub.f32 %v2564_v20, %v1231_v33 }
  0xa0   :  { %1051 = vmatpush.msra.mxu0 %v2814_v18  ;;  %1129 = vmatpush.msra.mxu2 %v2470_v17  ;;  %v2817_v6 = vand.u32 4294901760, %v2329_v11 }
  0xa1   :  { %1088 = vmatpush.msra.mxu1 %v2182_v36  ;;  %1204 = vmatpush.msra.mxu3 %v1203_v14  ;;  %v2816_v36 = vand.u32 4294901760, %v2309_v7  ;;  %v1243_v14 = vand.u32 4294901760, %v2591_v34  ;;  %v1145_v7 = vsub.f32 %v2580_v55, %v1144_v21  ;;  %v1233_v11 = vand.u32 4294901760, %v1232_v29 }
  0xa2   :  { %1055 = vmatpush.msra.mxu0 %v2815_v39  ;;  %1131 = vmatpush.msra.mxu2 %v2485_v51 }
  0xa3   :  { %1090 = vmatpush.msra.mxu1 %v2196_v52  ;;  %1210 = vmatpush.msra.mxu3 %v1209_v1  ;;  %v1238_v52 = vsub.f32 %v2577_v5, %v1237_v32  ;;  %v1244_v0 = vsub.f32 %v2591_v34, %v1243_v14 }
  0xa4   :  { %1059 = vmatpush.msra.mxu0 %v2816_v36  ;;  %1133 = vmatpush.msra.mxu2 %v2500_v43 }
  0xa5   :  { %1092 = vmatpush.msra.mxu1 %v2212_v10  ;;  %1216 = vmatpush.msra.mxu3 %v1215_v63  ;;  %v2818_v10 = vand.u32 4294901760, %v2357_v3  ;;  %v1239_v1 = vand.u32 4294901760, %v1238_v52  ;;  %v1245_v3 = vand.u32 4294901760, %v1244_v0 }
  0xa6   :  { %1063 = vmatpush.msra.mxu0 %v2817_v6  ;;  %1135 = vmatpush.msra.mxu2 %v2513_v38 }
  0xa7   :  { %1094 = vmatpush.msra.mxu1 %v2227_v35  ;;  %1222 = vmatpush.msra.mxu3 %v1221_v30  ;;  %v1146_v35 = vand.u32 4294901760, %v1145_v7 }
  0xa8   :  { %1067 = vmatpush.msra.mxu0 %v2818_v10  ;;  %1137 = vmatpush.msra.mxu2 %v2535_v48 }
  0xa9   :  { %1096 = vmatpush.msra.mxu1 %v2242_v50  ;;  %1228 = vmatpush.msra.mxu3 %v1227_v27  ;;  %v2819_v50 = vand.u32 4294901760, %v2350_v22 }
  0xaa   :  { %1069 = vmatmul.f32.vlgmr.msra.gmra.mxu0 %v2253_v26  ;;  %1139 = vmatpush.msra.mxu2 %v2551_v15 }
  0xab   :  { %1254 = vmatpush.msrb.mxu0 %v2350_v22  ;;  %1098 = vmatpush.msra.mxu1 %v2259_v12  ;;  %v2820_v12 = vand.u32 4294901760, %v2374_v54 }
  0xac   :  { %1234 = vmatpush.msra.mxu3 %v1233_v11  ;;  %1141 = vmatpush.msra.mxu2 %v2566_v60 }
  0xad   :  { %1257 = vmatpush.msrb.mxu0 %v2374_v54  ;;  %1100 = vmatpush.msra.mxu1 %v2271_v24  ;;  %v2821_v24 = vand.u32 4294901760, %v2387_v57 }
  0xae   :  { %1240 = vmatpush.msra.mxu3 %v1239_v1  ;;  %1147 = vmatmul.f32.vlgmr.msra.gmra.mxu2 %v1146_v35 }
  0xaf   :  { %1260 = vmatpush.msrb.mxu0 %v2387_v57  ;;  %1348 = vmatpush.msrb.mxu2 %v2819_v50 }
  0xb0   :  { %1102 = vmatpush.msra.mxu1 %v2298_v37  ;;  %1246 = vmatpush.msra.mxu3 %v1245_v3  ;;  %v2822_v37 = vand.u32 4294901760, %v2395_v42 }
  0xb1   :  { %1248 = vmatmul.f32.vlgmr.msra.gmra.mxu3 %v2553_v9  ;;  %1263 = vmatpush.msrb.mxu0 %v2395_v42  ;;  %v2825_v42 = vand.u32 4294901760, %v2451_v41 }
  0xb2   :  { %1352 = vmatpush.msrb.mxu2 %v2820_v12  ;;  %1415 = vmatpush.msrb.mxu3 %v2314_v40 }
  0xb3   :  { %1104 = vmatpush.msra.mxu1 %v2323_v47  ;;  %1266 = vmatpush.msrb.mxu0 %v2409_v4  ;;  %v2827_v47 = vand.u32 4294901760, %v2483_v16 }
  0xb4   :  { %1106 = vmatmul.f32.vlgmr.msra.gmra.mxu1 %v2253_v26  ;;  %1356 = vmatpush.msrb.mxu2 %v2821_v24  ;;  %v2823_v26 = vand.u32 4294901760, %v2409_v4 }
  0xb5   :  { %1307 = vmatpush.msrb.mxu1 %v2314_v40  ;;  %1417 = vmatpush.msrb.mxu3 %v2339_v31  ;;  %v2824_v40 = vand.u32 4294901760, %v2434_v44 }
  0xb6   :  { %1269 = vmatpush.msrb.mxu0 %v2434_v44  ;;  %1360 = vmatpush.msrb.mxu2 %v2822_v37 }
  0xb7   :  { %1309 = vmatpush.msrb.mxu1 %v2339_v31  ;;  %1419 = vmatpush.msrb.mxu3 %v2359_v8 }
  0xb8   :  { %1272 = vmatpush.msrb.mxu0 %v2451_v41  ;;  %1364 = vmatpush.msrb.mxu2 %v2823_v26 }
  0xb9   :  { %1311 = vmatpush.msrb.mxu1 %v2359_v8  ;;  %1421 = vmatpush.msrb.mxu3 %v2367_v28  ;;  %v2826_v8 = vand.u32 4294901760, %v2468_v19 }
  0xba   :  { %1275 = vmatpush.msrb.mxu0 %v2468_v19  ;;  %1368 = vmatpush.msrb.mxu2 %v2824_v40 }
  0xbb   :  { %1313 = vmatpush.msrb.mxu1 %v2367_v28  ;;  %1423 = vmatpush.msrb.mxu3 %v2379_v58 }
  0xbc   :  { %1278 = vmatpush.msrb.mxu0 %v2483_v16  ;;  %1372 = vmatpush.msrb.mxu2 %v2825_v42  ;;  %v125_v54 = vpop.f32.mrf.mxu0 }
  0xbd   :  { %1315 = vmatpush.msrb.mxu1 %v2379_v58  ;;  %1425 = vmatpush.msrb.mxu3 %v2402_v25  ;;  %v2828_v58 = vand.u32 4294901760, %v2498_v56 }
  0xbe   :  { %1281 = vmatpush.msrb.mxu0 %v2498_v56  ;;  %1376 = vmatpush.msrb.mxu2 %v2826_v8 }
  0xbf   :  { %1317 = vmatpush.msrb.mxu1 %v2402_v25  ;;  %1427 = vmatpush.msrb.mxu3 %v2420_v53  ;;  %v2829_v25 = vand.u32 4294901760, %v2511_v61 }
  0xc0   :  { %1284 = vmatpush.msrb.mxu0 %v2511_v61  ;;  %1380 = vmatpush.msrb.mxu2 %v2827_v47 }
  0xc1   :  { %1319 = vmatpush.msrb.mxu1 %v2420_v53  ;;  %1429 = vmatpush.msrb.mxu3 %v2436_v46 }
  0xc2   :  { %1287 = vmatpush.msrb.mxu0 %v2527_v49  ;;  %1384 = vmatpush.msrb.mxu2 %v2828_v58 }
  0xc3   :  { %1321 = vmatpush.msrb.mxu1 %v2436_v46  ;;  %1431 = vmatpush.msrb.mxu3 %v2453_v23 }
  0xc4   :  { %1290 = vmatpush.msrb.mxu0 %v2543_v62  ;;  %1388 = vmatpush.msrb.mxu2 %v2829_v25 }
  0xc5   :  { %1323 = vmatpush.msrb.mxu1 %v2453_v23  ;;  %1433 = vmatpush.msrb.mxu3 %v2470_v17 }
  0xc6   :  { %1293 = vmatpush.msrb.mxu0 %v2564_v20  ;;  %1392 = vmatpush.msrb.mxu2 %v1219_v45  ;;  %v226_v53 = vpop.f32.mrf.mxu1 }
  0xc7   :  { %1325 = vmatpush.msrb.mxu1 %v2470_v17  ;;  %1435 = vmatpush.msrb.mxu3 %v2485_v51  ;;  %v227_v57 = vadd.f32 %v226_v53, %v125_v54 }
  0xc8   :  { %1296 = vmatpush.msrb.mxu0 %v2577_v5  ;;  %1396 = vmatpush.msrb.mxu2 %v1225_v2  ;;  %v280_v31 = vpop.f32.mrf.mxu2  ;;  %v319_v4 = vpop.f32.mrf.mxu3 }
  0xc9   :  { %1327 = vmatpush.msrb.mxu1 %v2485_v51  ;;  %1437 = vmatpush.msrb.mxu3 %v2500_v43  ;;  %v281_v22 = vadd.f32 %v280_v31, %v227_v57 }
  0xca   :  { %1299 = vmatpush.msrb.mxu0 %v2591_v34  ;;  %1400 = vmatpush.msrb.mxu2 %v1231_v33 }
  0xcb   :  { %1329 = vmatpush.msrb.mxu1 %v2500_v43  ;;  %1439 = vmatpush.msrb.mxu3 %v2513_v38  ;;  %v320_v28 = vadd.f32 %v319_v4, %v281_v22 }
  0xcc   :  { %1302 = vmatmul.f32.vlgmr.msrb.gmra.mxu0 %v2580_v55  ;;  %1404 = vmatpush.msrb.mxu2 %v1237_v32 }
  0xcd   :  { %1331 = vmatpush.msrb.mxu1 %v2513_v38  ;;  %1441 = vmatpush.msrb.mxu3 %v2535_v48  ;;  %v388_v46 = vpop.f32.mrf.mxu0 }
  0xce   :  { %1408 = vmatpush.msrb.mxu2 %v1243_v14  ;;  %v389_v17 = vadd.f32 %v388_v46, %v320_v28 }
  0xcf   :  { %1333 = vmatpush.msrb.mxu1 %v2535_v48  ;;  %1443 = vmatpush.msrb.mxu3 %v2551_v15 }
  0xd0   :  { %1410 = vmatmul.f32.vlgmr.msrb.gmra.mxu2 %v2553_v9  ;;  %v425_v38 = vpop.f32.mrf.mxu1 }
  0xd1   :  { %1335 = vmatpush.msrb.mxu1 %v2551_v15  ;;  %1445 = vmatpush.msrb.mxu3 %v2566_v60  ;;  %v426_v44 = vadd.f32 %v425_v38, %v389_v17  ;;  %v466_v41 = vpop.f32.mrf.mxu2 }
  0xd2   :  { %1447 = vmatmul.f32.vlgmr.msrb.gmra.mxu3 %v2553_v9 }
  0xd3   :  { %1337 = vmatpush.msrb.mxu1 %v2566_v60  ;;  %v467_v23 = vadd.f32 %v466_v41, %v426_v44 }
  0xd4   :  { %1341 = vmatmul.f32.vlgmr.msrb.gmra.mxu1 %v1144_v21  ;;  %v567_v19 = vpop.f32.mrf.mxu3 }
  0xd5   :  { %v568_v51 = vadd.f32 %v567_v19, %v467_v23 }
  0xe3   :  { %v621_v16 = vpop.f32.mrf.mxu0 }
  0xe4   :  { %v622_v56 = vadd.f32 %v621_v16, %v568_v51 }
  0xed   :  { %v660_v62 = vpop.f32.mrf.mxu1  ;;  %v729_v45 = vpop.f32.mrf.mxu2 }
  0xee   :  { %v661_v43 = vadd.f32 %v660_v62, %v622_v56 }
  0xf0   :  { %v730_v61 = vadd.f32 %v729_v45, %v661_v43  ;;  %v766_v2 = vpop.f32.mrf.mxu3 }
  0xf2   :  { %v767_v48 = vadd.f32 %v766_v2, %v730_v61 }
 0x105   :  { %v807_v49 = vpop.f32.mrf.mxu0 }
 0x106   :  { %v808_v9 = vadd.f32 %v807_v49, %v767_v48 }
 0x10f   :  { %v908_v15 = vpop.f32.mrf.mxu1  ;;  %v962_v60 = vpop.f32.mrf.mxu2 }
 0x110   :  { %v909_v20 = vadd.f32 %v908_v15, %v808_v9 }
 0x112   :  { %v963_v5 = vadd.f32 %v962_v60, %v909_v20  ;;  %v1001_v55 = vpop.f32.mrf.mxu3 }
 0x114   :  { %v1002_v18 = vadd.f32 %v1001_v55, %v963_v5 }
 0x127   :  { %v1070_v13 = vpop.f32.mrf.mxu0 }
 0x128   :  { %v1071_v34 = vadd.f32 %v1070_v13, %v1002_v18 }
 0x131   :  { %v1107_v33 = vpop.f32.mrf.mxu1  ;;  %v1148_v59 = vpop.f32.mrf.mxu2 }
 0x132   :  { %v1108_v63 = vadd.f32 %v1107_v33, %v1071_v34 }
 0x134   :  { %v1149_v39 = vadd.f32 %v1148_v59, %v1108_v63  ;;  %v1249_v32 = vpop.f32.mrf.mxu3 }
 0x136   :  { %v1250_v30 = vadd.f32 %v1249_v32, %v1149_v39 }
 0x149   :  { %v1303_v21 = vpop.f32.mrf.mxu0 }
 0x14a   :  { %v1304_v36 = vadd.f32 %v1303_v21, %v1250_v30 }
 0x151   :  { %v1342_v29 = vpop.f32.mrf.mxu1 }
 0x152   :  { %v1343_v14 = vadd.f32 %v1342_v29, %v1304_v36 }
 0x153   :  { %v1411_v27 = vpop.f32.mrf.mxu2 }
 0x154   :  { %v1412_v6 = vadd.f32 %v1411_v27, %v1343_v14 }
 0x155   :  { %v1448_v52 = vpop.f32.mrf.mxu3 }
 0x156   :  { %v1449_v7 = vadd.f32 %v1448_v52, %v1412_v6 }
 0x158   :  { %1451 = vst [vmem:[#allocation2] sm:$0x3] %v1449_v7 }
 0x159   :  { %1462 = dma.vmem_to_hbm [thread:$0]  %s1458_s23, 32, %s1460_s26, [#allocation3]  }
 0x15a   :  { %1493 = dma.done.wait [#allocation3], 32  }
 0x15b   :  { %1494 = vsyncadd [#allocation3], 4294967264 }
 0x15c   :  { %1467 = vsyncpa [#allocation3], 1 }

</bundles_post_ra>
